<compile_context>
chip_gen: v5e
topology: v5e:2x2
jax: 0.10.0
libtpu: 0.0.40
codegen_flags: <defaults>
</compile_context>

<pallas_src>
import math
import jax
import jax.numpy as jnp
from jax.experimental import pallas as pl
from jax.experimental.pallas import tpu as pltpu


# ----------------------------------------------------------------------------- kernel
def _router_kernel(x_ref, w1_ref, b1_ref, w2_ref, out_ref):
    # x:  (tb, H)   native dtype (f32 or bf16)
    # w1: (H, Rp)   native dtype, zero-padded columns R..Rp-1
    # b1: (1, Rp)   f32, b1[Rp-1] == 1.0 (constant-one column for the b2 fold)
    # w2: (Rp, E)   f32, zero rows R..Rp-2, row Rp-1 == b2
    # out:(tb, E)

    # Linear 1: MXU consumes the native dtype directly, accumulates in f32.
    h = jnp.dot(x_ref[...], w1_ref[...], preferred_element_type=jnp.float32)
    # Bias + ReLU in f32 (VPU); padded columns stay 0, column Rp-1 becomes 1.0.
    h = jnp.maximum(h + b1_ref[...], 0.0)

    # Linear 2 in f32 (matches reference numerics; tiny (tb,128)x(128,E) GEMM).
    # b2 rides along via the constant-one column of h and the last row of w2.
    logits = jnp.dot(h, w2_ref[...], preferred_element_type=jnp.float32)

    # Numerically stable row softmax over the expert axis (f32, exact divide so
    # the router weights sum to 1 for the downstream MoE combine).
    m = jnp.max(logits, axis=-1, keepdims=True)
    e = jnp.exp(logits - m)
    out_ref[...] = (e / jnp.sum(e, axis=-1, keepdims=True)).astype(out_ref.dtype)


# ---------------------------------------------------------------- one-time param prep
def prepare_task_router_params(w1, b1, w2, b2):
    """Model-load-time prep: pad R to a lane-dense multiple of 128 and fold b2.

    w1: (H, R), b1: (R,), w2: (R, E), b2: (E,)  (weights stored as (in, out)).
    Call this ONCE; pass the returned tensors to task_router_forward every step.
    """
    H, R = w1.shape
    E = w2.shape[1]
    # Room for one extra "bias" row, rounded up to a multiple of 128 lanes.
    Rp = ((R + 1 + 127) // 128) * 128

    w1_p = jnp.zeros((H, Rp), w1.dtype).at[:, :R].set(w1)
    # b1 kept in f32 (added to the f32 accumulator); last slot = 1.0 so that
    # h[:, Rp-1] = ReLU(0 + 1) = 1 -> b2 rides the second matmul.
    b1_p = jnp.zeros((1, Rp), jnp.float32).at[0, :R].set(b1.astype(jnp.float32))
    b1_p = b1_p.at[0, Rp - 1].set(1.0)
    # w2 stored padded in f32 so the second GEMM runs fully in f32.
    w2_p = jnp.zeros((Rp, E), jnp.float32).at[:R, :].set(w2.astype(jnp.float32))
    w2_p = w2_p.at[Rp - 1, :].set(b2.astype(jnp.float32))
    return w1_p, b1_p, w2_p


# -------------------------------------------------------------------------- forward
_TWO_STEP_MIN_B = 4096  # only split the batch when both v7x TCs have real work


def _choose_batch_tile(B):
    """Single grid step normally (v5e/v6e are single-TC; extra steps are pure
    overhead). Two steps only when B is large enough to feed both v7x cores."""
    if B >= _TWO_STEP_MIN_B:
        half = -(-B // 2)            # cdiv(B, 2)
        return -(-half // 16) * 16   # round up to 16 (bf16 sublane packing)
    return B


def task_router_forward(x, w1_p, b1_p, w2_p):
    """task_weight = softmax(ReLU(x @ W1 + b1) @ W2 + b2, axis=-1).

    x    : (B, H)   task_presentation
    w1_p : (H, Rp)  prepared by prepare_task_router_params
    b1_p : (1, Rp)
    w2_p : (Rp, E)
    """
    B, H = x.shape
    Rp = w1_p.shape[1]
    E = w2_p.shape[1]

    tb = _choose_batch_tile(B)
    grid = (pl.cdiv(B, tb),)

    return pl.pallas_call(
        _router_kernel,
        out_shape=jax.ShapeDtypeStruct((B, E), x.dtype),
        grid_spec=pltpu.PrefetchScalarGridSpec(
            num_scalar_prefetch=0,
            grid=grid,
            in_specs=[
                pl.BlockSpec((tb, H), lambda i: (i, 0)),   # x: tiled over batch
                # Constant index_map -> weights are DMA'd once and stay resident
                # in VMEM across grid steps (total weight footprint is KiB-scale,
                # far below scoped VMEM on every chip).
                pl.BlockSpec((H, Rp), lambda i: (0, 0)),
                pl.BlockSpec((1, Rp), lambda i: (0, 0)),
                pl.BlockSpec((Rp, E), lambda i: (0, 0)),
            ],
            out_specs=pl.BlockSpec((tb, E), lambda i: (i, 0)),
        ),
        compiler_params=pltpu.CompilerParams(
            # Batch rows are independent -> when grid=(2,), the two steps are
            # sharded across the two TensorCores on v7x; harmless elsewhere.
            dimension_semantics=("parallel",)),
    )(x, w1_p, b1_p, w2_p)


# ----------------------------------------------------------------------- test helpers
def _init_linear(key, fan_in, fan_out, dtype):
    """Deterministic init mimicking torch.nn.Linear defaults."""
    kw, kb = jax.random.split(key)
    bound = 1.0 / math.sqrt(fan_in)
    # stored as (in, out) = transpose of torch's (out, in)
    w = jax.random.uniform(kw, (fan_in, fan_out), dtype=jnp.float32,
                           minval=-bound, maxval=bound).astype(dtype)
    b = jax.random.uniform(kb, (fan_out,), dtype=jnp.float32,
                           minval=-bound, maxval=bound).astype(dtype)
    return w, b


def _reference_forward(x, w1, b1, w2, b2):
    xf = x.astype(jnp.float32)
    h = jnp.maximum(xf @ w1.astype(jnp.float32) + b1.astype(jnp.float32), 0.0)
    logits = h @ w2.astype(jnp.float32) + b2.astype(jnp.float32)
    return jax.nn.softmax(logits, axis=-1).astype(x.dtype)


if __name__ == "__main__":
    # Config: hidden_size=32, router_hidden_dim=64, num_experts=8,
    # num_router_mlp_layers=2, dropout inactive (inference).
    # TODO(synk): training-mode dropout masks are not applied (identity at eval).
    hidden, router_hidden, num_experts = 32, 64, 8
    key = jax.random.PRNGKey(0)
    kx, k1, k2 = jax.random.split(key, 3)

    fwd = jax.jit(task_router_forward)

    # --- Check 1: f32, small batch (single grid step), tight tolerance --------
    batch = 8
    x32 = jax.random.normal(kx, (batch, hidden), dtype=jnp.float32)
    w1f, b1f = _init_linear(k1, hidden, router_hidden, jnp.float32)
    w2f, b2f = _init_linear(k2, router_hidden, num_experts, jnp.float32)
    params_f32 = prepare_task_router_params(w1f, b1f, w2f, b2f)   # once, at "load"

    tw32 = jax.block_until_ready(fwd(x32, *params_f32))
    ref32 = _reference_forward(x32, w1f, b1f, w2f, b2f)
    assert tw32.shape == (batch, num_experts)
    assert jnp.allclose(tw32, ref32, atol=1e-4, rtol=1e-4)
    assert jnp.allclose(jnp.sum(tw32, axis=-1), 1.0, atol=1e-5)

    # --- Check 2: bf16, large batch -> exactly two "parallel" grid steps ------
    batch_big = 8192
    dtype = jnp.bfloat16
    xb = jax.random.normal(kx, (batch_big, hidden), dtype=jnp.float32).astype(dtype)
    w1b, b1b = _init_linear(k1, hidden, router_hidden, dtype)
    w2b, b2b = _init_linear(k2, router_hidden, num_experts, dtype)
    params_bf16 = prepare_task_router_params(w1b, b1b, w2b, b2b)  # once, at "load"

    twb = jax.block_until_ready(fwd(xb, *params_bf16))
    refb = _reference_forward(xb, w1b, b1b, w2b, b2b)
    assert twb.shape == (batch_big, num_experts)
    assert jnp.allclose(twb.astype(jnp.float32), refb.astype(jnp.float32),
                        atol=2e-2, rtol=2e-2)
    assert jnp.allclose(jnp.sum(twb.astype(jnp.float32), axis=-1), 1.0, atol=2e-2)

    print("KERNEL_OK")
</pallas_src>

<mosaic_0001>
module attributes {stable_mosaic.version = 11 : i64} {
  func.func @_router_kernel(%arg0: i32, %arg1: memref<8x32xf32, #tpu.memory_space<vmem>>, %arg2: memref<32x128xf32, #tpu.memory_space<vmem>>, %arg3: memref<1x128xf32, #tpu.memory_space<vmem>>, %arg4: memref<128x8xf32, #tpu.memory_space<vmem>>, %arg5: memref<8x8xf32, #tpu.memory_space<vmem>>) attributes {dimension_semantics = [#tpu.dimension_semantics<parallel>], iteration_bounds = array<i64: 1>, scalar_prefetch = 0 : i64, scratch_operands = 0 : i64, tpu.core_type = #tpu.core_type<tc>, window_params = [{transform_indices = @transform_0, window_bounds = array<i64: 8, 32>}, {pipeline_mode = #tpu.pipeline_mode<synchronous>, transform_indices = @transform_1, window_bounds = array<i64: 32, 128>}, {pipeline_mode = #tpu.pipeline_mode<synchronous>, transform_indices = @transform_2, window_bounds = array<i64: 1, 128>}, {pipeline_mode = #tpu.pipeline_mode<synchronous>, transform_indices = @transform_3, window_bounds = array<i64: 128, 8>}, {transform_indices = @transform_4, window_bounds = array<i64: 8, 8>}]} {
    %c0 = arith.constant 0 : index
    %c0_0 = arith.constant 0 : index
    %0 = vector.load %arg1[%c0, %c0_0] : memref<8x32xf32, #tpu.memory_space<vmem>>, vector<8x32xf32>
    %c0_1 = arith.constant 0 : index
    %c0_2 = arith.constant 0 : index
    %1 = vector.load %arg2[%c0_1, %c0_2] : memref<32x128xf32, #tpu.memory_space<vmem>>, vector<32x128xf32>
    %cst = arith.constant dense<0.000000e+00> : vector<8x128xf32>
    %2 = tpu.matmul %0, %1, %cst {dimension_numbers = #tpu.dot_dimension_numbers<[1], [0], [0], [1], [0, 0, 1, 1], [], []>} : vector<8x32xf32>, vector<32x128xf32>, vector<8x128xf32> -> vector<8x128xf32>
    %c0_3 = arith.constant 0 : index
    %c0_4 = arith.constant 0 : index
    %3 = vector.load %arg3[%c0_3, %c0_4] : memref<1x128xf32, #tpu.memory_space<vmem>>, vector<1x128xf32>
    %4 = vector.broadcast %3 : vector<1x128xf32> to vector<8x128xf32>
    %5 = arith.addf %2, %4 : vector<8x128xf32>
    %cst_5 = arith.constant 0.000000e+00 : f32
    %6 = vector.broadcast %cst_5 : f32 to vector<8x128xf32>
    %7 = arith.maximumf %5, %6 : vector<8x128xf32>
    %c0_6 = arith.constant 0 : index
    %c0_7 = arith.constant 0 : index
    %8 = vector.load %arg4[%c0_6, %c0_7] : memref<128x8xf32, #tpu.memory_space<vmem>>, vector<128x8xf32>
    %cst_8 = arith.constant dense<0.000000e+00> : vector<8x8xf32>
    %9 = tpu.matmul %7, %8, %cst_8 {dimension_numbers = #tpu.dot_dimension_numbers<[1], [0], [0], [1], [0, 0, 1, 1], [], []>} : vector<8x128xf32>, vector<128x8xf32>, vector<8x8xf32> -> vector<8x8xf32>
    %cst_9 = arith.constant dense<0xFF800000> : vector<8xf32>
    %10 = vector.multi_reduction <maximumf>, %9, %cst_9 [1] : vector<8x8xf32> to vector<8xf32>
    %11 = vector.shape_cast %10 : vector<8xf32> to vector<8x1xf32>
    %12 = vector.broadcast %11 : vector<8x1xf32> to vector<8x8xf32>
    %13 = arith.subf %9, %12 : vector<8x8xf32>
    %14 = math.exp %13 : vector<8x8xf32>
    %cst_10 = arith.constant dense<0.000000e+00> : vector<8xf32>
    %15 = vector.multi_reduction <add>, %14, %cst_10 [1] : vector<8x8xf32> to vector<8xf32>
    %16 = vector.shape_cast %15 : vector<8xf32> to vector<8x1xf32>
    %17 = vector.broadcast %16 : vector<8x1xf32> to vector<8x8xf32>
    %18 = arith.divf %14, %17 : vector<8x8xf32>
    %c0_11 = arith.constant 0 : index
    %c0_12 = arith.constant 0 : index
    %19 = vector.load %arg5[%c0_11, %c0_12] : memref<8x8xf32, #tpu.memory_space<vmem>>, vector<8x8xf32>
    tpu.vector_store %arg5[%c0_11, %c0_12], %18 {strides = array<i32>} : memref<8x8xf32, #tpu.memory_space<vmem>>, vector<8x8xf32>,
    return
  }
  func.func @transform_0(%arg0: i32) -> (i32, i32) {
    %c0_i32 = arith.constant 0 : i32
    %c0_i32_0 = arith.constant 0 : i32
    return %arg0, %c0_i32 : i32, i32
  }
  func.func @transform_1(%arg0: i32) -> (i32, i32) {
    %c0_i32 = arith.constant 0 : i32
    %c0_i32_0 = arith.constant 0 : i32
    %c0_i32_1 = arith.constant 0 : i32
    return %c0_i32, %c0_i32_0 : i32, i32
  }
  func.func @transform_2(%arg0: i32) -> (i32, i32) {
    %c0_i32 = arith.constant 0 : i32
    %c0_i32_0 = arith.constant 0 : i32
    %c0_i32_1 = arith.constant 0 : i32
    return %c0_i32, %c0_i32_0 : i32, i32
  }
  func.func @transform_3(%arg0: i32) -> (i32, i32) {
    %c0_i32 = arith.constant 0 : i32
    %c0_i32_0 = arith.constant 0 : i32
    %c0_i32_1 = arith.constant 0 : i32
    return %c0_i32, %c0_i32_0 : i32, i32
  }
  func.func @transform_4(%arg0: i32) -> (i32, i32) {
    %c0_i32 = arith.constant 0 : i32
    %c0_i32_0 = arith.constant 0 : i32
    return %arg0, %c0_i32 : i32, i32
  }
}

</mosaic_0001>

<bundles_post_ra>
// kernel: task_router_forward.1
= control target key start
LH: loop header
LB: loop body
LE: loop exit
PB: predicated region body
PF: predicated region fallthrough
CT: control target
= control target key end

     0   :  { %vm27_vm0 = vcmask 261120   ;;  %s261_s0 = inlined_call_operand.vmem [shape: f32[8,32], index: 0, kind: input, shape index: {}]   ;;  %s262_s1 = inlined_call_operand.vmem [shape: f32[32,128], index: 1, kind: input, shape index: {}]   ;;  %s263_s2 = inlined_call_operand.vmem [shape: f32[1,128], index: 2, kind: input, shape index: {}]   ;;  %s264_s3 = inlined_call_operand.vmem [shape: f32[128,8], index: 3, kind: input, shape index: {}]   ;;  %s265_s4 = inlined_call_operand.hbm [shape: f32[8,8], index: 4, kind: output, shape index: {}]  }
   0x1   :  { %v22_v0 = vld [vmem:[%s262_s1 + $0x18] sm:$0xff]  ;;  %v21_v1 = vld [vmem:[%s262_s1 + $0x10] sm:$0xff]  ;;  %v20_v3 = vld [vmem:[%s262_s1 + $0x8] sm:$0xff] }
   0x2   :  { %43 = vmatpush.msra.mxu0 %v22_v0  ;;  %v67_v2 = vld [vmem:[%s264_s3 + $0x78] sm:$0xff]  ;;  %v66_v4 = vld [vmem:[%s264_s3 + $0x70] sm:$0xff]  ;;  %v65_v5 = vld [vmem:[%s264_s3 + $0x68] sm:$0xff] }
   0x3   :  { %68 = vmatpush.msra.mxu1 %v67_v2  ;;  %v19_v6 = vld [vmem:[%s262_s1] sm:$0xff] }
   0x4   :  { %44 = vmatpush.msra.mxu0 %v21_v1  ;;  %v18_v7 = vld [vmem:[%s261_s0] sm:$0xff] }
   0x5   :  { %69 = vmatpush.msra.mxu1 %v66_v4  ;;  %v64_v8 = vld [vmem:[%s264_s3 + $0x60] sm:$0xff] }
   0x6   :  { %45 = vmatpush.msra.mxu0 %v20_v3 }
   0x7   :  { %70 = vmatpush.msra.mxu1 %v65_v5 }
   0x8   :  { %9 = vsyncpa [#allocation3], 0  ;;  %46 = vmatpush.msra.mxu0 %v19_v6  ;;  %v63_v9 = vld [vmem:[%s264_s3 + $0x58] sm:$0xff]  ;;  %v62_v10 = vld [vmem:[%s264_s3 + $0x50] sm:$0xff]  ;;  %vm88_vm1 = vcmask 64512   ;;  %s121_s7 = sshll.u32 %s265_s4, 4  ;;  %s122_s7 = int_to_ptr.hbm [resolvable:$true] %s121_s7 }
   0x9   :  { %130 = vmatmul.msk.f32.vlgmr.msra.gmra.mxu0 %vm27_vm0, %v18_v7  ;;  %71 = vmatpush.msra.mxu1 %v64_v8  ;;  %v61_v11 = vld [vmem:[%s264_s3 + $0x48] sm:$0xff]  ;;  %v60_v12 = vld [vmem:[%s264_s3 + $0x40] sm:$0xff]  ;;  %v59_v13 = vld [vmem:[%s264_s3 + $0x38] sm:$0xff] }
   0xa   :  { %v58_v14 = vld [vmem:[%s264_s3 + $0x30] sm:$0xff]  ;;  %v57_v15 = vld [vmem:[%s264_s3 + $0x28] sm:$0xff]  ;;  %v56_v16 = vld [vmem:[%s264_s3 + $0x20] sm:$0xff] }
   0xb   :  { %72 = vmatpush.msra.mxu1 %v63_v9  ;;  %v55_v17 = vld [vmem:[%s264_s3 + $0x18] sm:$0xff]  ;;  %v54_v18 = vld [vmem:[%s264_s3 + $0x10] sm:$0xff]  ;;  %v53_v19 = vld [vmem:[%s264_s3 + $0x8] sm:$0xff] }
   0xc   :  { %v52_v20 = vld [vmem:[%s264_s3] sm:$0xff] }
   0xd   :  { %73 = vmatpush.msra.mxu1 %v62_v10  ;;  %v132_v21 = vld [vmem:[%s263_s2] ss:$0 sm:$0xff]  ;;  %s163_s2 = smov [#allocation2]  }
   0xe   :  { %s119_s3 = sshll.u32 %s163_s2, 4  ;;  %s120_s3 = int_to_ptr.vmem [resolvable:$true] %s119_s3 }
   0xf   :  { %74 = vmatpush.msra.mxu1 %v61_v11 }
  0x11   :  { %75 = vmatpush.msra.mxu1 %v60_v12 }
  0x13   :  { %76 = vmatpush.msra.mxu1 %v59_v13 }
  0x15   :  { %77 = vmatpush.msra.mxu1 %v58_v14 }
  0x17   :  { %78 = vmatpush.msra.mxu1 %v57_v15 }
  0x19   :  { %79 = vmatpush.msra.mxu1 %v56_v16 }
  0x1b   :  { %80 = vmatpush.msra.mxu1 %v55_v17 }
  0x1d   :  { %81 = vmatpush.msra.mxu1 %v54_v18 }
  0x1f   :  { %82 = vmatpush.msra.mxu1 %v53_v19 }
  0x21   :  { %83 = vmatpush.msra.mxu1 %v52_v20 }
  0x86   :  { %v48_v22 = vpop.f32.mrf.mxu0 }
  0x87   :  { %v49_v23 = vadd.f32 %v132_v21, %v48_v22 }
  0x89   :  { %v51_v24 = vmax.f32 %v49_v23, 0.0 }
  0x8b   :  { %84 = vmatmul.f32.vlgmr.msra.gmra.mxu1 %v51_v24 }
 0x108   :  { %v85_v25 = vpop.f32.mrf.mxu1 }
 0x109   :  { %v89_v26 = vsel %vm88_vm1, %v85_v25, -inf }
 0x10a   :  { %90 = vmax.xlane.f32.xlu0 %v89_v26 }
 0x17d   :  { %v91_v27 = vpop.xlane.xlu0 %90 }
 0x17e   :  { %v92_v28 = vsub.f32 %v85_v25, %v91_v27 }
 0x180   :  { %v93_v29 = vmul.f32 1.442695, %v92_v28 }
 0x182   :  { %133 = vpow2.f32 %v93_v29 }
 0x188   :  { %v134_v30 = vpop.eup %133 }
 0x189   :  { %v95_v31 = vsel %vm88_vm1, %v134_v30, 0.0 }
 0x18a   :  { %96 = vadd.xlane.f32.xlu0 %v95_v31 }
 0x1fd   :  { %v97_v32 = vpop.xlane.xlu0 %96 }
 0x1fe   :  { %135 = vrcp.f32 %v97_v32  ;;  %v109_v36 = vand.u32 2147483648, %v97_v32  ;;  %v107_v38 = vand.u32 2147483647, %v97_v32  ;;  %vm103_vm3 = vweird.f32 %v97_v32 }
 0x200   :  { %v110_v40 = vor.u32 1.1754944e-38, %v109_v36  ;;  %vm108_vm5 = vcmp.eq.f32.partialorder %v107_v38, 8.507059e+37 }
 0x204   :  { %v136_v33 = vpop.eup %135 }
 0x205   :  { %v99_v34 = vmul.f32 %v136_v33, %v97_v32  ;;  %vm104_vm2 = vweird.f32 %v136_v33 }
 0x206   :  { %vm105_vm4 = vmor %vm103_vm3, %vm104_vm2 }
 0x207   :  { %v100_v35 = vsub.f32 1.0, %v99_v34 }
 0x209   :  { %v101_v37 = vmul.f32 %v136_v33, %v100_v35 }
 0x20b   :  { %v102_v39 = vadd.f32 %v136_v33, %v101_v37 }
 0x20d   :  { %v106_v41 = vsel %vm105_vm4, %v136_v33, %v102_v39 }
 0x20e   :  { %v111_v42 = vsel %vm108_vm5, %v110_v40, %v106_v41 }
 0x20f   :  { %v112_v43 = vmul.f32 %v134_v30, %v111_v42 }
 0x211   :  { %113 = vst.msk [vmem:[#allocation2] sm:$0xff] %vm88_vm1, %v112_v43 }
 0x212   :  { %124 = dma.vmem_to_hbm [thread:$0]  %s120_s3, 128, %s122_s7, [#allocation3]  }
 0x213   :  { %161 = dma.done.wait [#allocation3], 128  }
 0x214   :  { %162 = vsyncadd [#allocation3], 4294967168 }
 0x215   :  { %129 = vsyncpa [#allocation3], 1 }

</bundles_post_ra>
